<compile_context>
chip_gen: v6e
topology: v6e:2x2x1
jax: 0.10.0
libtpu: 0.0.40
codegen_flags: <defaults>
</compile_context>

<pallas_src>
import jax
import jax.numpy as jnp
from jax.experimental import pallas as pl
from jax.experimental.pallas import tpu as pltpu

F32 = jnp.float32
BF16 = jnp.bfloat16


def _round_up(x, m):
    return ((x + m - 1) // m) * m


def _dscmr_kernel(
    img_ref, txt_ref,                 # bf16 inputs, batch-padded
    w_img_bb_ref, b_img_bb_ref,       # stand-in image backbone (Linear+ReLU)
    w_txt_bb_ref, b_txt_bb_ref,       # stand-in text backbone  (Linear+ReLU)
    w_img_lin_ref, b_img_lin_ref,     # img_linear: Linear + ReLU
    w_txt_lin_ref, b_txt_lin_ref,     # txt_linear: Linear + ReLU
    w_comb_ref, b_comb_ref,           # fused feature_linear + classifier
    out_ref,                          # packed [2*BP, N_PACK] f32 slab
):
    def linear(x_bf16, w_ref, b_ref):
        # bf16 x bf16 matmul on the MXU, f32 accumulation, f32 bias.
        return jnp.dot(x_bf16, w_ref[...], preferred_element_type=F32) + b_ref[...]

    # ---- per-modality backbones (stand-ins) + modality-specific linear ------
    img_bb = jnp.maximum(linear(img_ref[...], w_img_bb_ref, b_img_bb_ref), 0.0)
    txt_bb = jnp.maximum(linear(txt_ref[...], w_txt_bb_ref, b_txt_bb_ref), 0.0)

    img_h = jnp.maximum(linear(img_bb.astype(BF16), w_img_lin_ref, b_img_lin_ref), 0.0)
    txt_h = jnp.maximum(linear(txt_bb.astype(BF16), w_txt_lin_ref, b_txt_lin_ref), 0.0)

    # ---- stack modalities: shared layers run as ONE wide matmul -------------
    h = jnp.concatenate([img_h, txt_h], axis=0).astype(BF16)     # [2*BP, out_dim]

    # fused feature_linear + classifier (lane-dense N) -> packed output slab
    out_ref[...] = jnp.dot(h, w_comb_ref[...], preferred_element_type=F32) \
        + b_comb_ref[...]


def dscmr_forward(img, text, params):
    """img: [B, C, H, W]; text: [B, seq, emb].

    Returns (img_feats, txt_feats, img_pred, txt_pred) matching
    DSCMR_Net.forward semantics.
    """
    B = img.shape[0]
    img_flat = img.reshape(B, -1).astype(F32)
    txt_flat = text.reshape(B, -1).astype(F32)

    output_dim = params["w_feat"].shape[0]
    feature_dim = params["w_feat"].shape[1]
    class_dim = params["w_cls"].shape[1]

    # ---- batch padding to a multiple of 8 sublanes --------------------------
    BP = max(8, _round_up(B, 8))
    img_p = jnp.pad(img_flat, ((0, BP - B), (0, 0))).astype(BF16)
    txt_p = jnp.pad(txt_flat, ((0, BP - B), (0, 0))).astype(BF16)

    # ---- fuse feature_linear + classifier, pad N to a multiple of 128 -------
    w_feat = params["w_feat"].astype(BF16).astype(F32)
    w_cls = params["w_cls"].astype(BF16).astype(F32)
    b_feat = params["b_feat"].astype(F32)
    b_cls = params["b_cls"].astype(F32)

    n_valid = feature_dim + class_dim
    n_pack = _round_up(n_valid, 128)
    w_fc = jnp.dot(w_feat, w_cls, preferred_element_type=F32)        # [D, class]
    w_comb = jnp.concatenate([w_feat, w_fc], axis=1)                 # [D, n_valid]
    w_comb = jnp.pad(w_comb, ((0, 0), (0, n_pack - n_valid))).astype(BF16)
    b_fc = jnp.dot(b_feat, w_cls, preferred_element_type=F32) + b_cls
    b_comb = jnp.concatenate([b_feat, b_fc], axis=1)
    b_comb = jnp.pad(b_comb, ((0, 0), (0, n_pack - n_valid))).astype(F32)

    inputs = (
        img_p, txt_p,
        params["w_img_bb"].astype(BF16), params["b_img_bb"].astype(F32),
        params["w_txt_bb"].astype(BF16), params["b_txt_bb"].astype(F32),
        params["w_img_lin"].astype(BF16), params["b_img_lin"].astype(F32),
        params["w_txt_lin"].astype(BF16), params["b_txt_lin"].astype(F32),
        w_comb, b_comb,
    )

    def full_spec(x):
        # Full-extent block: entire (small) operand lives in VMEM.
        return pl.BlockSpec(x.shape, lambda: (0,) * x.ndim)

    out_shape = jax.ShapeDtypeStruct((2 * BP, n_pack), F32)
    out_spec = pl.BlockSpec((2 * BP, n_pack), lambda: (0, 0))

    img_in_dim = img_p.shape[1]
    txt_in_dim = txt_p.shape[1]
    img_bb_dim = params["w_img_bb"].shape[1]
    txt_bb_dim = params["w_txt_bb"].shape[1]

    flops = 2 * BP * (img_in_dim * img_bb_dim + img_bb_dim * output_dim
                      + txt_in_dim * txt_bb_dim + txt_bb_dim * output_dim) \
        + 2 * (2 * BP) * output_dim * n_pack
    bytes_accessed = sum(int(x.size) * x.dtype.itemsize for x in inputs) \
        + 2 * BP * n_pack * 4
    cost = pl.CostEstimate(flops=int(flops), transcendentals=0,
                           bytes_accessed=int(bytes_accessed))

    # TODO(synk): at these toy sizes a single grid-less invocation on one
    # TensorCore is optimal; at production batch sizes add a batch grid with
    # dimension_semantics=("parallel",) to use both v7x TensorCores.
    slab = pl.pallas_call(
        _dscmr_kernel,
        out_shape=out_shape,
        grid=(),
        in_specs=[full_spec(x) for x in inputs],
        out_specs=out_spec,
        cost_estimate=cost,
        compiler_params=pltpu.CompilerParams(),
    )(*inputs)

    # ---- unpack the lane-dense slab & drop batch padding ---------------------
    img_feats = slab[0:B, 0:feature_dim]
    txt_feats = slab[BP:BP + B, 0:feature_dim]
    img_pred = slab[0:B, feature_dim:feature_dim + class_dim]
    txt_pred = slab[BP:BP + B, feature_dim:feature_dim + class_dim]
    return img_feats, txt_feats, img_pred, txt_pred


def init_params(key, img_in_dim, txt_in_dim,
                img_feats_dim=128, txt_feats_dim=128,
                output_dim=128, feature_dim=64, class_dim=10):
    """Deterministic synthetic weights (Linear weights stored as [in, out])."""
    ks = jax.random.split(key, 6)
    scale = 0.05

    def lin(k, din, dout):
        w = jax.random.normal(k, (din, dout), F32) * scale
        b = jax.random.normal(jax.random.fold_in(k, 1), (1, dout), F32) * scale
        return w, b

    w_img_bb, b_img_bb = lin(ks[0], img_in_dim, img_feats_dim)
    w_txt_bb, b_txt_bb = lin(ks[1], txt_in_dim, txt_feats_dim)
    w_img_lin, b_img_lin = lin(ks[2], img_feats_dim, output_dim)
    w_txt_lin, b_txt_lin = lin(ks[3], txt_feats_dim, output_dim)
    w_feat, b_feat = lin(ks[4], output_dim, feature_dim)
    w_cls, b_cls = lin(ks[5], feature_dim, class_dim)
    return dict(
        w_img_bb=w_img_bb, b_img_bb=b_img_bb,
        w_txt_bb=w_txt_bb, b_txt_bb=b_txt_bb,
        w_img_lin=w_img_lin, b_img_lin=b_img_lin,
        w_txt_lin=w_txt_lin, b_txt_lin=b_txt_lin,
        w_feat=w_feat, b_feat=b_feat,
        w_cls=w_cls, b_cls=b_cls,
    )


def _ref_forward(img, text, params):
    """Pure-JAX reference with the same bf16-weight / f32-accumulate scheme,
    but un-fused feature_linear -> classifier (original module semantics)."""
    def mm(x, w):
        return jnp.dot(x.astype(BF16), w.astype(BF16), preferred_element_type=F32)

    def branch(x_flat, wbb, bbb, wlin, blin):
        bb = jnp.maximum(mm(x_flat, wbb) + bbb, 0.0)
        h = jnp.maximum(mm(bb, wlin) + blin, 0.0)
        f = mm(h, params["w_feat"]) + params["b_feat"]
        p = mm(f, params["w_cls"]) + params["b_cls"]
        return f, p

    B = img.shape[0]
    ref_if, ref_ip = branch(img.reshape(B, -1), params["w_img_bb"],
                            params["b_img_bb"], params["w_img_lin"],
                            params["b_img_lin"])
    ref_tf, ref_tp = branch(text.reshape(B, -1), params["w_txt_bb"],
                            params["b_txt_bb"], params["w_txt_lin"],
                            params["b_txt_lin"])
    return ref_if, ref_tf, ref_ip, ref_tp


if __name__ == "__main__":
    key = jax.random.PRNGKey(0)
    k_img, k_txt, k_par = jax.random.split(key, 3)

    # Small shapes: batch=2, channels=4, spatial=16, seq=8, embedding_dim=32.
    B, C, H, W = 2, 4, 16, 16
    SEQ, EMB = 8, 32
    img = jax.random.normal(k_img, (B, C, H, W), F32)
    text = jax.random.normal(k_txt, (B, SEQ, EMB), F32)

    params = init_params(k_par, img_in_dim=C * H * W, txt_in_dim=SEQ * EMB)

    img_feats, txt_feats, img_pred, txt_pred = dscmr_forward(img, text, params)
    jax.block_until_ready((img_feats, txt_feats, img_pred, txt_pred))

    ref_if, ref_tf, ref_ip, ref_tp = _ref_forward(img, text, params)

    # Tolerance accounts for the (documented) feature/classifier fusion
    # re-association and bf16 rounding of the combined weight.
    assert jnp.allclose(img_feats, ref_if, atol=1e-2, rtol=2e-2)
    assert jnp.allclose(txt_feats, ref_tf, atol=1e-2, rtol=2e-2)
    assert jnp.allclose(img_pred, ref_ip, atol=1e-2, rtol=2e-2)
    assert jnp.allclose(txt_pred, ref_tp, atol=1e-2, rtol=2e-2)

    print("KERNEL_OK")
</pallas_src>

<mosaic_0001>
module attributes {stable_mosaic.version = 11 : i64} {
  func.func @_dscmr_kernel(%arg0: memref<8x1024xbf16, #tpu.memory_space<vmem>>, %arg1: memref<8x256xbf16, #tpu.memory_space<vmem>>, %arg2: memref<1024x128xbf16, #tpu.memory_space<vmem>>, %arg3: memref<1x128xf32, #tpu.memory_space<vmem>>, %arg4: memref<256x128xbf16, #tpu.memory_space<vmem>>, %arg5: memref<1x128xf32, #tpu.memory_space<vmem>>, %arg6: memref<128x128xbf16, #tpu.memory_space<vmem>>, %arg7: memref<1x128xf32, #tpu.memory_space<vmem>>, %arg8: memref<128x128xbf16, #tpu.memory_space<vmem>>, %arg9: memref<1x128xf32, #tpu.memory_space<vmem>>, %arg10: memref<128x128xbf16, #tpu.memory_space<vmem>>, %arg11: memref<1x128xf32, #tpu.memory_space<vmem>>, %arg12: memref<16x128xf32, #tpu.memory_space<vmem>>) attributes {dimension_semantics = [], scalar_prefetch = 0 : i64, scratch_operands = 0 : i64, tpu.core_type = #tpu.core_type<tc>} {
    %c0 = arith.constant 0 : index
    %c0_0 = arith.constant 0 : index
    %0 = vector.load %arg0[%c0, %c0_0] : memref<8x1024xbf16, #tpu.memory_space<vmem>>, vector<8x1024xbf16>
    %c0_1 = arith.constant 0 : index
    %c0_2 = arith.constant 0 : index
    %1 = vector.load %arg2[%c0_1, %c0_2] : memref<1024x128xbf16, #tpu.memory_space<vmem>>, vector<1024x128xbf16>
    %cst = arith.constant dense<0.000000e+00> : vector<8x128xf32>
    %2 = tpu.matmul %0, %1, %cst {dimension_numbers = #tpu.dot_dimension_numbers<[1], [0], [0], [1], [0, 0, 1, 1], [], []>} : vector<8x1024xbf16>, vector<1024x128xbf16>, vector<8x128xf32> -> vector<8x128xf32>
    %c0_3 = arith.constant 0 : index
    %c0_4 = arith.constant 0 : index
    %3 = vector.load %arg3[%c0_3, %c0_4] : memref<1x128xf32, #tpu.memory_space<vmem>>, vector<1x128xf32>
    %4 = vector.broadcast %3 : vector<1x128xf32> to vector<8x128xf32>
    %5 = arith.addf %2, %4 : vector<8x128xf32>
    %cst_5 = arith.constant 0.000000e+00 : f32
    %6 = vector.broadcast %cst_5 : f32 to vector<8x128xf32>
    %7 = arith.maximumf %5, %6 : vector<8x128xf32>
    %c0_6 = arith.constant 0 : index
    %c0_7 = arith.constant 0 : index
    %8 = vector.load %arg1[%c0_6, %c0_7] : memref<8x256xbf16, #tpu.memory_space<vmem>>, vector<8x256xbf16>
    %c0_8 = arith.constant 0 : index
    %c0_9 = arith.constant 0 : index
    %9 = vector.load %arg4[%c0_8, %c0_9] : memref<256x128xbf16, #tpu.memory_space<vmem>>, vector<256x128xbf16>
    %cst_10 = arith.constant dense<0.000000e+00> : vector<8x128xf32>
    %10 = tpu.matmul %8, %9, %cst_10 {dimension_numbers = #tpu.dot_dimension_numbers<[1], [0], [0], [1], [0, 0, 1, 1], [], []>} : vector<8x256xbf16>, vector<256x128xbf16>, vector<8x128xf32> -> vector<8x128xf32>
    %c0_11 = arith.constant 0 : index
    %c0_12 = arith.constant 0 : index
    %11 = vector.load %arg5[%c0_11, %c0_12] : memref<1x128xf32, #tpu.memory_space<vmem>>, vector<1x128xf32>
    %12 = vector.broadcast %11 : vector<1x128xf32> to vector<8x128xf32>
    %13 = arith.addf %10, %12 : vector<8x128xf32>
    %cst_13 = arith.constant 0.000000e+00 : f32
    %14 = vector.broadcast %cst_13 : f32 to vector<8x128xf32>
    %15 = arith.maximumf %13, %14 : vector<8x128xf32>
    %16 = arith.truncf %7 : vector<8x128xf32> to vector<8x128xbf16>
    %c0_14 = arith.constant 0 : index
    %c0_15 = arith.constant 0 : index
    %17 = vector.load %arg6[%c0_14, %c0_15] : memref<128x128xbf16, #tpu.memory_space<vmem>>, vector<128x128xbf16>
    %cst_16 = arith.constant dense<0.000000e+00> : vector<8x128xf32>
    %18 = tpu.matmul %16, %17, %cst_16 {dimension_numbers = #tpu.dot_dimension_numbers<[1], [0], [0], [1], [0, 0, 1, 1], [], []>} : vector<8x128xbf16>, vector<128x128xbf16>, vector<8x128xf32> -> vector<8x128xf32>
    %c0_17 = arith.constant 0 : index
    %c0_18 = arith.constant 0 : index
    %19 = vector.load %arg7[%c0_17, %c0_18] : memref<1x128xf32, #tpu.memory_space<vmem>>, vector<1x128xf32>
    %20 = vector.broadcast %19 : vector<1x128xf32> to vector<8x128xf32>
    %21 = arith.addf %18, %20 : vector<8x128xf32>
    %cst_19 = arith.constant 0.000000e+00 : f32
    %22 = vector.broadcast %cst_19 : f32 to vector<8x128xf32>
    %23 = arith.maximumf %21, %22 : vector<8x128xf32>
    %24 = arith.truncf %15 : vector<8x128xf32> to vector<8x128xbf16>
    %c0_20 = arith.constant 0 : index
    %c0_21 = arith.constant 0 : index
    %25 = vector.load %arg8[%c0_20, %c0_21] : memref<128x128xbf16, #tpu.memory_space<vmem>>, vector<128x128xbf16>
    %cst_22 = arith.constant dense<0.000000e+00> : vector<8x128xf32>
    %26 = tpu.matmul %24, %25, %cst_22 {dimension_numbers = #tpu.dot_dimension_numbers<[1], [0], [0], [1], [0, 0, 1, 1], [], []>} : vector<8x128xbf16>, vector<128x128xbf16>, vector<8x128xf32> -> vector<8x128xf32>
    %c0_23 = arith.constant 0 : index
    %c0_24 = arith.constant 0 : index
    %27 = vector.load %arg9[%c0_23, %c0_24] : memref<1x128xf32, #tpu.memory_space<vmem>>, vector<1x128xf32>
    %28 = vector.broadcast %27 : vector<1x128xf32> to vector<8x128xf32>
    %29 = arith.addf %26, %28 : vector<8x128xf32>
    %cst_25 = arith.constant 0.000000e+00 : f32
    %30 = vector.broadcast %cst_25 : f32 to vector<8x128xf32>
    %31 = arith.maximumf %29, %30 : vector<8x128xf32>
    %32 = tpu.concatenate %23, %31 in 0 : vector<8x128xf32>, vector<8x128xf32> -> vector<16x128xf32>
    %33 = arith.truncf %32 : vector<16x128xf32> to vector<16x128xbf16>
    %c0_26 = arith.constant 0 : index
    %c0_27 = arith.constant 0 : index
    %34 = vector.load %arg10[%c0_26, %c0_27] : memref<128x128xbf16, #tpu.memory_space<vmem>>, vector<128x128xbf16>
    %cst_28 = arith.constant dense<0.000000e+00> : vector<16x128xf32>
    %35 = tpu.matmul %33, %34, %cst_28 {dimension_numbers = #tpu.dot_dimension_numbers<[1], [0], [0], [1], [0, 0, 1, 1], [], []>} : vector<16x128xbf16>, vector<128x128xbf16>, vector<16x128xf32> -> vector<16x128xf32>
    %c0_29 = arith.constant 0 : index
    %c0_30 = arith.constant 0 : index
    %36 = vector.load %arg11[%c0_29, %c0_30] : memref<1x128xf32, #tpu.memory_space<vmem>>, vector<1x128xf32>
    %37 = vector.broadcast %36 : vector<1x128xf32> to vector<16x128xf32>
    %38 = arith.addf %35, %37 : vector<16x128xf32>
    %c0_31 = arith.constant 0 : index
    %c0_32 = arith.constant 0 : index
    %39 = vector.load %arg12[%c0_31, %c0_32] : memref<16x128xf32, #tpu.memory_space<vmem>>, vector<16x128xf32>
    tpu.vector_store %arg12[%c0_31, %c0_32], %38 {strides = array<i32>} : memref<16x128xf32, #tpu.memory_space<vmem>>, vector<16x128xf32>,
    return
  }
}

</mosaic_0001>

<bundles_post_ra>
// kernel: tpu_custom_call.1
= control target key start
LH: loop header
LB: loop body
LE: loop exit
PB: predicated region body
PF: predicated region fallthrough
CT: control target
= control target key end

     0   :  { %17 = vsyncpa [#allocation3], 0  ;;  %s2168_s0 = inlined_call_operand.hbm [shape: bf16[8,1024], index: 0, kind: input, shape index: {}]   ;;  %s2169_s1 = inlined_call_operand.hbm [shape: bf16[8,256], index: 1, kind: input, shape index: {}]   ;;  %s2170_s2 = inlined_call_operand.hbm [shape: bf16[1024,128], index: 2, kind: input, shape index: {}]   ;;  %s2171_s3 = inlined_call_operand.vmem [shape: f32[1,128], index: 3, kind: input, shape index: {}]   ;;  %s2172_s4 = inlined_call_operand.hbm [shape: bf16[256,128], index: 4, kind: input, shape index: {}]   ;;  %s2173_s5 = inlined_call_operand.vmem [shape: f32[1,128], index: 5, kind: input, shape index: {}]   ;;  %s2174_s6 = inlined_call_operand.hbm [shape: bf16[128,128], index: 6, kind: input, shape index: {}]   ;;  %s2175_s7 = inlined_call_operand.vmem [shape: f32[1,128], index: 7, kind: input, shape index: {}]   ;;  %s2176_s8 = inlined_call_operand.hbm [shape: bf16[128,128], index: 8, kind: input, shape index: {}]   ;;  %s2177_s9 = inlined_call_operand.vmem [shape: f32[1,128], index: 9, kind: input, shape index: {}]   ;;  %s2178_s10 = inlined_call_operand.hbm [shape: bf16[128,128], index: 10, kind: input, shape index: {}]   ;;  %s2179_s11 = inlined_call_operand.vmem [shape: f32[1,128], index: 11, kind: input, shape index: {}]   ;;  %s2180_s12 = inlined_call_operand.hbm [shape: f32[16,128], index: 12, kind: output, shape index: {}]  }
   0x1   :  { %18 = vsyncpa [#allocation6], 0 }
   0x2   :  { %19 = vsyncpa [#allocation9], 0 }
   0x3   :  { %20 = vsyncpa [#allocation12], 0 }
   0x4   :  { %21 = vsyncpa [#allocation4], 0  ;;  %s2005_s21 = smov [#allocation5]  }
   0x5   :  { %s38_s22 = sshll.u32 %s2005_s21, 4  ;;  %s39_s22 = int_to_ptr.vmem [resolvable:$true] %s38_s22 }
   0x6   :  { %s1843_s23 = scalar_lea.vmem %s39_s22, 128  ;;  %p1848_p1 = scmp.lt.s32.totalorder %s39_s22, %s39_s22 }
   0x7   :  { %p1844_p0 = scmp.ne.s32.totalorder %s39_s22, %s1843_s23  ;;  %p1849_p2 = scmp.lt.s32.totalorder %s1843_s23, %s1843_s23 }
   0x9   :  { %p1850_p3 = por %p1849_p2, %p1848_p1 }
   0xb   :  { %p1851_p4 = pnand %p1850_p3, %p1844_p0 }
   0xd   :  { %1854 = shalt.err (!%p1851_p4)
}
   0xe   :  { %41 = dma.hbm_to_vmem [thread:$0]  %s2169_s1, 128, %s39_s22, [#allocation6]  }
   0xf   :  { %s2006_s26 = smov [#allocation8]   ;;  %s2007_s28 = smov [#allocation11]  }
  0x10   :  { %s61_s27 = sshll.u32 %s2006_s26, 4  ;;  %s89_s29 = sshll.u32 %s2007_s28, 4  ;;  %s62_s27 = int_to_ptr.vmem [resolvable:$true] %s61_s27  ;;  %s90_s29 = int_to_ptr.vmem [resolvable:$true] %s89_s29 }
  0x11   :  { %s1863_s30 = scalar_lea.vmem %s62_s27, 2048  ;;  %p1868_p6 = scmp.lt.s32.totalorder %s62_s27, %s62_s27 }
  0x12   :  { %p1864_p5 = scmp.ne.s32.totalorder %s62_s27, %s1863_s30  ;;  %p1869_p7 = scmp.lt.s32.totalorder %s1863_s30, %s1863_s30 }
  0x14   :  { %p1870_p8 = por %p1869_p7, %p1868_p6 }
  0x16   :  { %p1871_p9 = pnand %p1870_p8, %p1864_p5 }
  0x18   :  { %1874 = shalt.err (!%p1871_p9)
}
  0x19   :  { %s2008_s13 = smov 64   ;;  %s2009_s14 = smov 4  }
  0x1a   :  { %67 = dma.hbm_to_vmem [thread:$0]  %s2172_s4, 2048, %s62_s27, [#allocation9], %s2008_s13, %s2008_s13, %s2009_s14  }
  0x1b   :  { %s1883_s1 = scalar_lea.vmem %s90_s29, 1024  ;;  %p1888_p11 = scmp.lt.s32.totalorder %s90_s29, %s90_s29 }
  0x1c   :  { %p1884_p10 = scmp.ne.s32.totalorder %s90_s29, %s1883_s1  ;;  %p1889_p12 = scmp.lt.s32.totalorder %s1883_s1, %s1883_s1 }
  0x1e   :  { %p1890_p13 = por %p1889_p12, %p1888_p11 }
  0x20   :  { %p1891_p0 = pnand %p1890_p13, %p1884_p10 }
  0x22   :  { %1894 = shalt.err (!%p1891_p0)
}
  0x23   :  { %95 = dma.hbm_to_vmem [thread:$0]  %s2176_s8, 1024, %s90_s29, [#allocation12], %s2008_s13, %s2008_s13, %s2009_s14  }
  0x24   :  { %s2010_s19 = smov [#allocation2]   ;;  %s2011_s21 = smov [#allocation7]  }
  0x25   :  { %s28_s20 = sshll.u32 %s2010_s19, 4  ;;  %s47_s4 = sshll.u32 %s2011_s21, 4  ;;  %s29_s20 = int_to_ptr.vmem [resolvable:$true] %s28_s20  ;;  %s48_s4 = int_to_ptr.vmem [resolvable:$true] %s47_s4 }
  0x26   :  { %s1903_s22 = scalar_lea.vmem %s29_s20, 512  ;;  %p1908_p2 = scmp.lt.s32.totalorder %s29_s20, %s29_s20 }
  0x27   :  { %p1904_p1 = scmp.ne.s32.totalorder %s29_s20, %s1903_s22  ;;  %p1909_p3 = scmp.lt.s32.totalorder %s1903_s22, %s1903_s22 }
  0x29   :  { %p1910_p4 = por %p1909_p3, %p1908_p2 }
  0x2b   :  { %p1911_p5 = pnand %p1910_p4, %p1904_p1 }
  0x2d   :  { %1914 = shalt.err (!%p1911_p5)
}
  0x2e   :  { %31 = dma.hbm_to_vmem [thread:$0]  %s2168_s0, 512, %s29_s20, [#allocation3]  }
  0x2f   :  { %s1923_s25 = scalar_lea.vmem %s48_s4, 8192  ;;  %p1928_p7 = scmp.lt.s32.totalorder %s48_s4, %s48_s4 }
  0x30   :  { %p1924_p6 = scmp.ne.s32.totalorder %s48_s4, %s1923_s25  ;;  %p1929_p8 = scmp.lt.s32.totalorder %s1923_s25, %s1923_s25 }
  0x32   :  { %p1930_p9 = por %p1929_p8, %p1928_p7 }
  0x34   :  { %p1931_p10 = pnand %p1930_p9, %p1924_p6 }
  0x36   :  { %1934 = shalt.err (!%p1931_p10)
}
  0x37   :  { %53 = dma.hbm_to_vmem [thread:$0]  %s2170_s2, 8192, %s48_s4, [#allocation6], %s2008_s13, %s2008_s13, %s2009_s14  }
  0x38   :  { %s2012_s27 = smov [#allocation10]   ;;  %s2013_s29 = smov [#allocation13]  }
  0x39   :  { %s75_s28 = sshll.u32 %s2012_s27, 4  ;;  %s103_s0 = sshll.u32 %s2013_s29, 4  ;;  %s76_s28 = int_to_ptr.vmem [resolvable:$true] %s75_s28  ;;  %s104_s0 = int_to_ptr.vmem [resolvable:$true] %s103_s0 }
  0x3a   :  { %s1943_s30 = scalar_lea.vmem %s76_s28, 1024  ;;  %p1948_p12 = scmp.lt.s32.totalorder %s76_s28, %s76_s28 }
  0x3b   :  { %p1944_p11 = scmp.ne.s32.totalorder %s76_s28, %s1943_s30  ;;  %p1949_p13 = scmp.lt.s32.totalorder %s1943_s30, %s1943_s30 }
  0x3d   :  { %p1950_p0 = por %p1949_p13, %p1948_p12 }
  0x3f   :  { %p1951_p1 = pnand %p1950_p0, %p1944_p11 }
  0x41   :  { %1954 = shalt.err (!%p1951_p1)
}
  0x42   :  { %81 = dma.hbm_to_vmem [thread:$0]  %s2174_s6, 1024, %s76_s28, [#allocation9], %s2008_s13, %s2008_s13, %s2009_s14  }
  0x43   :  { %s1963_s2 = scalar_lea.vmem %s104_s0, 1024  ;;  %p1968_p3 = scmp.lt.s32.totalorder %s104_s0, %s104_s0 }
  0x44   :  { %p1964_p2 = scmp.ne.s32.totalorder %s104_s0, %s1963_s2  ;;  %p1969_p4 = scmp.lt.s32.totalorder %s1963_s2, %s1963_s2 }
  0x46   :  { %p1970_p5 = por %p1969_p4, %p1968_p3 }
  0x48   :  { %p1971_p6 = pnand %p1970_p5, %p1964_p2 }
  0x4a   :  { %1974 = shalt.err (!%p1971_p6)
}
  0x4b   :  { %109 = dma.hbm_to_vmem [thread:$0]  %s2178_s10, 1024, %s104_s0, [#allocation12], %s2008_s13, %s2008_s13, %s2009_s14  }
  0x4c   :  { %1995 = dma.done.wait [#allocation3], 512  }
  0x4d   :  { %1996 = vsyncadd [#allocation3], 4294966784 }
  0x4e   :  { %1997 = dma.done.wait [#allocation6], 8320  }
  0x4f   :  { %1998 = vsyncadd [#allocation6], 4294958976 }
  0x50   :  { %1999 = dma.done.wait [#allocation9], 3072  }
  0x51   :  { %2000 = vsyncadd [#allocation9], 4294964224 }
  0x52   :  { %2001 = dma.done.wait [#allocation12], 2048  }
  0x53   :  { %2002 = vsyncadd [#allocation12], 4294965248  ;;  %v1721_v0 = vld [vmem:[#allocation7 + $0x78] sm:$0xff]   ;;  %v1725_v4 = vld [vmem:[#allocation7 + $0x70] sm:$0xff]   ;;  %vm2015_vm0 = vmmov 0  }
  0x54   :  { %v1722_v1 = vld [vmem:[#allocation7 + $0x38] sm:$0xff]   ;;  %1510 = vmatprep.subr.bf16.mxu0 %v1721_v0  ;;  %v1726_v5 = vld [vmem:[#allocation7 + $0x30] sm:$0xff]   ;;  %v1729_v8 = vld [vmem:[#allocation7 + $0x68] sm:$0xff]  }
  0x55   :  { %v1723_v2 = vld [vmem:[#allocation7 + $0xf8] sm:$0xff]   ;;  %1511 = vmatpush3.bf16.msra.mxu0 %v1722_v1  ;;  %v1727_v6 = vld [vmem:[#allocation7 + $0xf0] sm:$0xff]   ;;  %v1730_v9 = vld [vmem:[#allocation7 + $0x28] sm:$0xff]  }
  0x56   :  { %v1724_v3 = vld [vmem:[#allocation7 + $0xb8] sm:$0xff]   ;;  %1532 = vmatprep.subr.bf16.mxu1 %v1723_v2  ;;  %1512 = vmatprep.subr.bf16.mxu0 %v1725_v4  ;;  %v1728_v7 = vld [vmem:[#allocation7 + $0xb0] sm:$0xff]   ;;  %v1731_v10 = vld [vmem:[#allocation7 + $0xe8] sm:$0xff]  }
  0x57   :  { %1533 = vmatpush3.bf16.msra.mxu1 %v1724_v3  ;;  %v1732_v11 = vld [vmem:[#allocation7 + $0xa8] sm:$0xff]   ;;  %v1733_v12 = vld [vmem:[#allocation7 + $0x60] sm:$0xff]   ;;  %v1737_v16 = vld [vmem:[#allocation7 + $0x58] sm:$0xff]  }
  0x58   :  { %1534 = vmatprep.subr.bf16.mxu1 %v1727_v6  ;;  %v1734_v13 = vld [vmem:[#allocation7 + $0x20] sm:$0xff]   ;;  %v1738_v17 = vld [vmem:[#allocation7 + $0x18] sm:$0xff]   ;;  %v1741_v20 = vld [vmem:[#allocation7 + $0x50] sm:$0xff]  }
  0x59   :  { %1513 = vmatpush3.bf16.msra.mxu0 %v1726_v5  ;;  %v1735_v14 = vld [vmem:[#allocation7 + $0xe0] sm:$0xff]   ;;  %v1739_v18 = vld [vmem:[#allocation7 + $0xd8] sm:$0xff]   ;;  %v1742_v21 = vld [vmem:[#allocation7 + $0x10] sm:$0xff]  }
  0x5a   :  { %1514 = vmatprep.subr.bf16.mxu0 %v1729_v8  ;;  %v1736_v15 = vld [vmem:[#allocation7 + $0xa0] sm:$0xff]   ;;  %v1740_v19 = vld [vmem:[#allocation7 + $0x98] sm:$0xff]   ;;  %v1743_v22 = vld [vmem:[#allocation7 + $0xd0] sm:$0xff]  }
  0x5b   :  { %1535 = vmatpush3.bf16.msra.mxu1 %v1728_v7  ;;  %v1744_v23 = vld [vmem:[#allocation7 + $0x90] sm:$0xff]   ;;  %v1745_v24 = vld [vmem:[#allocation7 + $0x48] sm:$0xff]   ;;  %v1749_v28 = vld [vmem:[#allocation7 + $0x40] sm:$0xff]  }
  0x5c   :  { %1536 = vmatprep.subr.bf16.mxu1 %v1731_v10  ;;  %v1746_v25 = vld [vmem:[#allocation7 + $0x8] sm:$0xff]   ;;  %v1750_v29 = vld [vmem:[#allocation7] sm:$0xff]   ;;  %v134_v31 = vld [vmem:[#allocation2] sm:$0xff] }
  0x5d   :  { %1515 = vmatpush3.bf16.msra.mxu0 %v1730_v9  ;;  %v1747_v26 = vld [vmem:[#allocation7 + $0xc8] sm:$0xff]   ;;  %v1751_v30 = vld [vmem:[#allocation7 + $0xc0] sm:$0xff]   ;;  %v1392_v32 = vcombine.low %v134_v31, %v134_v31  ;;  %v1393_v33 = vcombine.high %v134_v31, %v134_v31  ;;  %v1755_v35 = vld [vmem:[#allocation7 + $0x178] sm:$0xff]  }
  0x5e   :  { %1516 = vmatprep.subr.bf16.mxu0 %v1733_v12  ;;  %v1748_v27 = vld [vmem:[#allocation7 + $0x88] sm:$0xff]   ;;  %v1754_v34 = vld [vmem:[#allocation7 + $0x80] sm:$0xff]   ;;  %v1758_v39 = vld [vmem:[#allocation7 + $0x138] sm:$0xff]  }
  0x5f   :  { %1537 = vmatpush3.bf16.msra.mxu1 %v1732_v11  ;;  %v135_v36 = vld [vmem:[#allocation2 + $0x8] sm:$0xff]  ;;  %717 = vmatprep.mubr.bf16.mxu0 %v1393_v33  ;;  %v1759_v40 = vld [vmem:[#allocation7 + $0x1f8] sm:$0xff]   ;;  %v1761_v42 = vld [vmem:[#allocation7 + $0x170] sm:$0xff]  }
  0x60   :  { %1538 = vmatprep.subr.bf16.mxu1 %v1735_v14  ;;  %v1394_v37 = vcombine.low %v135_v36, %v135_v36  ;;  %v1395_v38 = vcombine.high %v135_v36, %v135_v36  ;;  %v1760_v41 = vld [vmem:[#allocation7 + $0x1b8] sm:$0xff]   ;;  %v1762_v43 = vld [vmem:[#allocation7 + $0x130] sm:$0xff]   ;;  %v1765_v46 = vld [vmem:[#allocation7 + $0x168] sm:$0xff]  }
  0x61   :  { %1517 = vmatpush3.bf16.msra.mxu0 %v1734_v13  ;;  %v1763_v44 = vld [vmem:[#allocation7 + $0x1f0] sm:$0xff]   ;;  %v1766_v47 = vld [vmem:[#allocation7 + $0x128] sm:$0xff]   ;;  %v1769_v50 = vld [vmem:[#allocation7 + $0x160] sm:$0xff]  }
  0x62   :  { %1518 = vmatprep.subr.bf16.mxu0 %v1737_v16  ;;  %757 = vmatprep.mubr.bf16.mxu1 %v1395_v38  ;;  %v1764_v45 = vld [vmem:[#allocation7 + $0x1b0] sm:$0xff]   ;;  %v1767_v48 = vld [vmem:[#allocation7 + $0x1e8] sm:$0xff]   ;;  %v1770_v51 = vld [vmem:[#allocation7 + $0x120] sm:$0xff]  }
  0x63   :  { %1539 = vmatpush3.bf16.msra.mxu1 %v1736_v15  ;;  %v1768_v49 = vld [vmem:[#allocation7 + $0x1a8] sm:$0xff]   ;;  %v1771_v52 = vld [vmem:[#allocation7 + $0x1e0] sm:$0xff]   ;;  %v1773_v54 = vld [vmem:[#allocation7 + $0x158] sm:$0xff]  }
  0x64   :  { %1540 = vmatprep.subr.bf16.mxu1 %v1739_v18  ;;  %v1772_v53 = vld [vmem:[#allocation7 + $0x1a0] sm:$0xff]   ;;  %v1774_v55 = vld [vmem:[#allocation7 + $0x118] sm:$0xff]   ;;  %v1777_v58 = vld [vmem:[#allocation7 + $0x150] sm:$0xff]  }
  0x65   :  { %1519 = vmatpush3.bf16.msra.mxu0 %v1738_v17  ;;  %v1775_v56 = vld [vmem:[#allocation7 + $0x1d8] sm:$0xff]   ;;  %v1778_v59 = vld [vmem:[#allocation7 + $0x110] sm:$0xff]   ;;  %v1781_v62 = vld [vmem:[#allocation7 + $0x148] sm:$0xff]  }
  0x66   :  { %1520 = vmatprep.subr.bf16.mxu0 %v1741_v20  ;;  %v1776_v57 = vld [vmem:[#allocation7 + $0x198] sm:$0xff]   ;;  %v1779_v60 = vld [vmem:[#allocation7 + $0x1d0] sm:$0xff]   ;;  %v1782_v63 = vld [vmem:[#allocation7 + $0x108] sm:$0xff]  }
  0x67   :  { %1541 = vmatpush3.bf16.msra.mxu1 %v1740_v19  ;;  %v1780_v61 = vld [vmem:[#allocation7 + $0x190] sm:$0xff]   ;;  %v1783_v0 = vld [vmem:[#allocation7 + $0x1c8] sm:$0xff]   ;;  %v1785_v2 = vld [vmem:[#allocation7 + $0x140] sm:$0xff]  }
  0x68   :  { %1542 = vmatprep.subr.bf16.mxu1 %v1743_v22  ;;  %v1784_v1 = vld [vmem:[#allocation7 + $0x188] sm:$0xff]   ;;  %v1786_v3 = vld [vmem:[#allocation7 + $0x100] sm:$0xff]   ;;  %v1791_v9 = vld [vmem:[#allocation8 + $0x78] sm:$0xff]  }
  0x69   :  { %1521 = vmatpush3.bf16.msra.mxu0 %v1742_v21  ;;  %v1787_v4 = vld [vmem:[#allocation7 + $0x1c0] sm:$0xff]   ;;  %v136_v5 = vld [vmem:[#allocation2 + $0x10] sm:$0xff]  ;;  %v137_v10 = vld [vmem:[#allocation2 + $0x18] sm:$0xff] }
  0x6a   :  { %1522 = vmatprep.subr.bf16.mxu0 %v1745_v24  ;;  %v1396_v6 = vcombine.low %v136_v5, %v136_v5  ;;  %v1397_v7 = vcombine.high %v136_v5, %v136_v5  ;;  %v1790_v8 = vld [vmem:[#allocation7 + $0x180] sm:$0xff]   ;;  %v1398_v11 = vcombine.low %v137_v10, %v137_v10  ;;  %v1399_v12 = vcombine.high %v137_v10, %v137_v10  ;;  %v1794_v13 = vld [vmem:[#allocation8 + $0x38] sm:$0xff]   ;;  %v1795_v14 = vld [vmem:[#allocation8 + $0x70] sm:$0xff]  }
  0x6b   :  { %1543 = vmatpush3.bf16.msra.mxu1 %v1744_v23  ;;  %v1796_v15 = vld [vmem:[#allocation8 + $0x30] sm:$0xff]   ;;  %v1797_v16 = vld [vmem:[#allocation8 + $0x68] sm:$0xff]   ;;  %v1799_v18 = vld [vmem:[#allocation8 + $0x60] sm:$0xff]  }
  0x6c   :  { %1544 = vmatprep.subr.bf16.mxu1 %v1747_v26  ;;  %v1798_v17 = vld [vmem:[#allocation8 + $0x28] sm:$0xff]   ;;  %v1800_v19 = vld [vmem:[#allocation8 + $0x20] sm:$0xff]   ;;  %v1801_v20 = vld [vmem:[#allocation8 + $0x58] sm:$0xff]  }
  0x6d   :  { %1523 = vmatpush3.bf16.msra.mxu0 %v1746_v25  ;;  %v1802_v21 = vld [vmem:[#allocation8 + $0x18] sm:$0xff]   ;;  %v1803_v22 = vld [vmem:[#allocation8 + $0x50] sm:$0xff]   ;;  %v1805_v26 = vld [vmem:[#allocation8 + $0x48] sm:$0xff]  }
  0x6e   :  { %1524 = vmatprep.subr.bf16.mxu0 %v1749_v28  ;;  %v846_v23 = vld [vmem:[#allocation5] sm:$0xff]  ;;  %v1804_v25 = vld [vmem:[#allocation8 + $0x10] sm:$0xff]   ;;  %v1807_v28 = vld [vmem:[#allocation8 + $0x40] sm:$0xff]  }
  0x6f   :  { %1545 = vmatpush3.bf16.msra.mxu1 %v1748_v27  ;;  %v1466_v24 = vcombine.high %v846_v23, %v846_v23  ;;  %v1806_v27 = vld [vmem:[#allocation8 + $0x8] sm:$0xff]   ;;  %v1811_v31 = vld [vmem:[#allocation10 + $0x38] sm:$0xff]   ;;  %v1812_v33 = vld [vmem:[#allocation10 + $0x30] sm:$0xff]  }
  0x70   :  { %1546 = vmatprep.subr.bf16.mxu1 %v1751_v30  ;;  %v1465_v30 = vcombine.low %v846_v23, %v846_v23  ;;  %v1815_v36 = vld [vmem:[#allocation10 + $0x18] sm:$0xff]   ;;  %v1817_v38 = vld [vmem:[#allocation10 + $0x8] sm:$0xff]   ;;  %v1830_v23 = vld [vmem:[#allocation13 + $0x20] sm:$0xff]  }
  0x71   :  { %1525 = vmatpush3.bf16.msra.mxu0 %v1750_v29  ;;  %v1808_v29 = vld [vmem:[#allocation8] sm:$0xff]  }
  0x72   :  { %1554 = vmatprep.subr.bf16.mxu0 %v1755_v35  ;;  %v1814_v35 = vld [vmem:[#allocation10 + $0x20] sm:$0xff]  }
  0x73   :  { %1547 = vmatpush3.bf16.msra.mxu1 %v1754_v34  ;;  %v1813_v34 = vld [vmem:[#allocation10 + $0x28] sm:$0xff]  }
  0x74   :  { %718 = vmatmul.mubr.bf16.vlgmr.msra.gmra.mxu0 %v1392_v32  ;;  %1576 = vmatprep.subr.bf16.mxu1 %v1759_v40  ;;  %v2014_v32 = vmov 0.0   ;;  %v1819_v40 = vld [vmem:[#allocation11 + $0x38] sm:$0xff]  }
  0x75   :  { %1555 = vmatpush3.bf16.msra.mxu0 %v1758_v39  ;;  %797 = vmatprep.mubr.bf16.mxu0 %v1397_v7  ;;  %v1818_v39 = vld [vmem:[#allocation10] sm:$0xff]  }
  0x76   :  { %758 = vmatmul.mubr.bf16.vlgmr.msra.gmra.mxu1 %v1394_v37  ;;  %1556 = vmatprep.subr.bf16.mxu0 %v1761_v42  ;;  %v1816_v37 = vld [vmem:[#allocation10 + $0x10] sm:$0xff]   ;;  %v1821_v42 = vld [vmem:[#allocation11 + $0x28] sm:$0xff]  }
  0x77   :  { %1577 = vmatpush3.bf16.msra.mxu1 %v1760_v41  ;;  %837 = vmatprep.mubr.bf16.mxu1 %v1399_v12  ;;  %v1820_v41 = vld [vmem:[#allocation11 + $0x30] sm:$0xff]   ;;  %v1464_v12 = vld [vmem:[%s2173_s5] ss:$0 sm:$0xff] }
  0x78   :  { %1578 = vmatprep.subr.bf16.mxu1 %v1763_v44  ;;  %v1823_v44 = vld [vmem:[#allocation11 + $0x18] sm:$0xff]  }
  0x79   :  { %1557 = vmatpush3.bf16.msra.mxu0 %v1762_v43  ;;  %v1822_v43 = vld [vmem:[#allocation11 + $0x20] sm:$0xff]  }
  0x7a   :  { %1558 = vmatprep.subr.bf16.mxu0 %v1765_v46  ;;  %v1825_v46 = vld [vmem:[#allocation11 + $0x8] sm:$0xff]  }
  0x7b   :  { %1579 = vmatpush3.bf16.msra.mxu1 %v1764_v45  ;;  %v1824_v45 = vld [vmem:[#allocation11 + $0x10] sm:$0xff]  }
  0x7c   :  { %1580 = vmatprep.subr.bf16.mxu1 %v1767_v48 }
  0x7d   :  { %1559 = vmatpush3.bf16.msra.mxu0 %v1766_v47  ;;  %v1826_v47 = vld [vmem:[#allocation11] sm:$0xff]  }
  0x7e   :  { %1560 = vmatprep.subr.bf16.mxu0 %v1769_v50 }
  0x7f   :  { %1581 = vmatpush3.bf16.msra.mxu1 %v1768_v49 }
  0x80   :  { %1582 = vmatprep.subr.bf16.mxu1 %v1771_v52 }
  0x81   :  { %1561 = vmatpush3.bf16.msra.mxu0 %v1770_v51 }
  0x82   :  { %1562 = vmatprep.subr.bf16.mxu0 %v1773_v54 }
  0x83   :  { %1583 = vmatpush3.bf16.msra.mxu1 %v1772_v53 }
  0x84   :  { %1584 = vmatprep.subr.bf16.mxu1 %v1775_v56 }
  0x85   :  { %1563 = vmatpush3.bf16.msra.mxu0 %v1774_v55 }
  0x86   :  { %1564 = vmatprep.subr.bf16.mxu0 %v1777_v58 }
  0x87   :  { %1585 = vmatpush3.bf16.msra.mxu1 %v1776_v57  ;;  %v1391_v57 = vld [vmem:[%s2171_s3] ss:$0 sm:$0xff] }
  0x88   :  { %1586 = vmatprep.subr.bf16.mxu1 %v1779_v60 }
  0x89   :  { %1565 = vmatpush3.bf16.msra.mxu0 %v1778_v59 }
  0x8a   :  { %1566 = vmatprep.subr.bf16.mxu0 %v1781_v62 }
  0x8b   :  { %1587 = vmatpush3.bf16.msra.mxu1 %v1780_v61 }
  0x8c   :  { %1588 = vmatprep.subr.bf16.mxu1 %v1783_v0 }
  0x8d   :  { %1567 = vmatpush3.bf16.msra.mxu0 %v1782_v63 }
  0x8e   :  { %1568 = vmatprep.subr.bf16.mxu0 %v1785_v2 }
  0x8f   :  { %1589 = vmatpush3.bf16.msra.mxu1 %v1784_v1 }
  0x90   :  { %1590 = vmatprep.subr.bf16.mxu1 %v1787_v4 }
  0x91   :  { %1569 = vmatpush3.bf16.msra.mxu0 %v1786_v3 }
  0x92   :  { %1598 = vmatprep.subr.bf16.mxu0 %v1791_v9 }
  0x93   :  { %1591 = vmatpush3.bf16.msra.mxu1 %v1790_v8 }
  0x94   :  { %798 = vmatmul.mubr.bf16.vlgmr.msra.gmra.mxu0 %v1396_v6  ;;  %1647 = vmatprep.subr.bf16.mxu1 %v2014_v32 }
  0x95   :  { %1599 = vmatpush3.bf16.msra.mxu0 %v1794_v13  ;;  %1021 = vmatprep.mubr.bf16.mxu0 %v1466_v24  ;;  %v1831_v24 = vld [vmem:[#allocation13 + $0x18] sm:$0xff]  }
  0x96   :  { %838 = vmatmul.mubr.bf16.vlgmr.msra.gmra.mxu1 %v1398_v11  ;;  %1600 = vmatprep.subr.bf16.mxu0 %v1795_v14 }
  0x97   :  { %1648 = vmatpush3.bf16.msra.mxu1 %v1811_v31  ;;  %1663 = vmatprep.mubr.msk.bf16.mxu1 %vm2015_vm0, %v2014_v32 }
  0x98   :  { %1649 = vmatprep.subr.bf16.mxu1 %v2014_v32 }
  0x99   :  { %1601 = vmatpush3.bf16.msra.mxu0 %v1796_v15 }
  0x9a   :  { %1602 = vmatprep.subr.bf16.mxu0 %v1797_v16 }
  0x9b   :  { %1650 = vmatpush3.bf16.msra.mxu1 %v1812_v33  ;;  %v1483_v33 = vld [vmem:[%s2175_s7] ss:$0 sm:$0xff]  ;;  %s2016_s7 = smov [#allocation14]  }
  0x9c   :  { %1651 = vmatprep.subr.bf16.mxu1 %v2014_v32  ;;  %s1376_s4 = sshll.u32 %s2016_s7, 4  ;;  %s1377_s4 = int_to_ptr.vmem [resolvable:$true] %s1376_s4 }
  0x9d   :  { %1603 = vmatpush3.bf16.msra.mxu0 %v1798_v17  ;;  %p1980_p8 = scmp.lt.s32.totalorder %s1377_s4, %s1377_s4 }
  0x9e   :  { %1604 = vmatprep.subr.bf16.mxu0 %v1799_v18 }
  0x9f   :  { %1652 = vmatpush3.bf16.msra.mxu1 %v1813_v34  ;;  %v1492_v34 = vld [vmem:[%s2177_s9] ss:$0 sm:$0xff]  ;;  %s1975_s9 = scalar_lea.vmem %s1377_s4, 256 }
  0xa0   :  { %1653 = vmatprep.subr.bf16.mxu1 %v2014_v32  ;;  %p1976_p7 = scmp.ne.s32.totalorder %s1377_s4, %s1975_s9  ;;  %p1981_p9 = scmp.lt.s32.totalorder %s1975_s9, %s1975_s9 }
  0xa1   :  { %1605 = vmatpush3.bf16.msra.mxu0 %v1800_v19 }
  0xa2   :  { %1606 = vmatprep.subr.bf16.mxu0 %v1801_v20  ;;  %v1827_v20 = vld [vmem:[#allocation13 + $0x38] sm:$0xff]   ;;  %p1982_p10 = por %p1981_p9, %p1980_p8 }
  0xa3   :  { %1654 = vmatpush3.bf16.msra.mxu1 %v1814_v35 }
  0xa4   :  { %1655 = vmatprep.subr.bf16.mxu1 %v2014_v32  ;;  %p1983_p11 = pnand %p1982_p10, %p1976_p7 }
  0xa5   :  { %1607 = vmatpush3.bf16.msra.mxu0 %v1802_v21  ;;  %v1828_v21 = vld [vmem:[#allocation13 + $0x30] sm:$0xff]  }
  0xa6   :  { %1608 = vmatprep.subr.bf16.mxu0 %v1803_v22  ;;  %v1829_v22 = vld [vmem:[#allocation13 + $0x28] sm:$0xff]  }
  0xa7   :  { %1656 = vmatpush3.bf16.msra.mxu1 %v1815_v36 }
  0xa8   :  { %1657 = vmatprep.subr.bf16.mxu1 %v2014_v32 }
  0xa9   :  { %1609 = vmatpush3.bf16.msra.mxu0 %v1804_v25  ;;  %v1832_v25 = vld [vmem:[#allocation13 + $0x10] sm:$0xff]  }
  0xaa   :  { %1610 = vmatprep.subr.bf16.mxu0 %v1805_v26  ;;  %v1833_v26 = vld [vmem:[#allocation13 + $0x8] sm:$0xff]  }
  0xab   :  { %1658 = vmatpush3.bf16.msra.mxu1 %v1816_v37 }
  0xac   :  { %1659 = vmatprep.subr.bf16.mxu1 %v2014_v32 }
  0xad   :  { %1611 = vmatpush3.bf16.msra.mxu0 %v1806_v27  ;;  %v1834_v27 = vld [vmem:[#allocation13] sm:$0xff]  }
  0xae   :  { %1612 = vmatprep.subr.bf16.mxu0 %v1807_v28 }
  0xaf   :  { %1660 = vmatpush3.bf16.msra.mxu1 %v1817_v38 }
  0xb0   :  { %1661 = vmatprep.subr.bf16.mxu1 %v2014_v32 }
  0xb1   :  { %1613 = vmatpush3.bf16.msra.mxu0 %v1808_v29 }
  0xb2   :  { %1667 = vmatprep.subr.bf16.mxu0 %v2014_v32 }
  0xb3   :  { %1662 = vmatpush3.bf16.msra.mxu1 %v1818_v39 }
  0xb4   :  { %1022 = vmatmul.mubr.bf16.vlgmr.msra.gmra.mxu0 %v1465_v30  ;;  %1687 = vmatprep.subr.bf16.mxu1 %v2014_v32 }
  0xb5   :  { %1668 = vmatpush3.bf16.msra.mxu0 %v1819_v40  ;;  %1683 = vmatprep.mubr.msk.bf16.mxu0 %vm2015_vm0, %v2014_v32 }
  0xb6   :  { %1669 = vmatprep.subr.bf16.mxu0 %v2014_v32 }
  0xb9   :  { %1670 = vmatpush3.bf16.msra.mxu0 %v1820_v41 }
  0xba   :  { %1671 = vmatprep.subr.bf16.mxu0 %v2014_v32 }
  0xbd   :  { %1672 = vmatpush3.bf16.msra.mxu0 %v1821_v42 }
  0xbe   :  { %1673 = vmatprep.subr.bf16.mxu0 %v2014_v32 }
  0xc1   :  { %1674 = vmatpush3.bf16.msra.mxu0 %v1822_v43  ;;  %v1501_v43 = vld [vmem:[%s2179_s11] ss:$0 sm:$0xff] }
  0xc2   :  { %1675 = vmatprep.subr.bf16.mxu0 %v2014_v32 }
  0xc5   :  { %1676 = vmatpush3.bf16.msra.mxu0 %v1823_v44 }
  0xc6   :  { %1677 = vmatprep.subr.bf16.mxu0 %v2014_v32 }
  0xc9   :  { %1678 = vmatpush3.bf16.msra.mxu0 %v1824_v45 }
  0xca   :  { %1679 = vmatprep.subr.bf16.mxu0 %v2014_v32 }
  0xcd   :  { %1680 = vmatpush3.bf16.msra.mxu0 %v1825_v46 }
  0xce   :  { %1681 = vmatprep.subr.bf16.mxu0 %v2014_v32 }
  0xd1   :  { %1682 = vmatpush3.bf16.msra.mxu0 %v1826_v47 }
 0x134   :  { %v1526_v48 = vpop.f32.mrf.mxu0 }
 0x136   :  { %v1527_v49 = vpop.f32.mrf.mxu0  ;;  %v1548_v50 = vpop.f32.mrf.mxu1 }
 0x137   :  { %v1528_v56 = vadd.f32 %v1527_v49, %v1526_v48 }
 0x138   :  { %v1529_v51 = vpop.f32.mrf.mxu0  ;;  %v1549_v52 = vpop.f32.mrf.mxu1 }
 0x139   :  { %v720_v58 = vadd.f32 %v1528_v56, %v1391_v57  ;;  %v1550_v59 = vadd.f32 %v1549_v52, %v1548_v50 }
 0x13a   :  { %v1530_v53 = vpop.f32.mrf.mxu0  ;;  %v1551_v54 = vpop.f32.mrf.mxu1 }
 0x13b   :  { %v760_v62 = vadd.f32 %v1550_v59, %v720_v58 }
 0x13c   :  { %v1552_v55 = vpop.f32.mrf.mxu1 }
 0x154   :  { %v1570_v60 = vpop.f32.mrf.mxu0 }
 0x156   :  { %v1571_v61 = vpop.f32.mrf.mxu0  ;;  %v1592_v0 = vpop.f32.mrf.mxu1 }
 0x157   :  { %v1572_v63 = vadd.f32 %v1571_v61, %v1570_v60 }
 0x158   :  { %v1573_v1 = vpop.f32.mrf.mxu0  ;;  %v1593_v3 = vpop.f32.mrf.mxu1 }
 0x159   :  { %v800_v2 = vadd.f32 %v1572_v63, %v760_v62  ;;  %v1594_v4 = vadd.f32 %v1593_v3, %v1592_v0 }
 0x15a   :  { %v1574_v5 = vpop.f32.mrf.mxu0  ;;  %v1595_v6 = vpop.f32.mrf.mxu1 }
 0x15b   :  { %v840_v7 = vadd.f32 %v1594_v4, %v800_v2 }
 0x15c   :  { %v1596_v8 = vpop.f32.mrf.mxu1 }
 0x15d   :  { %v845_v9 = vmax.f32 %v840_v7, 0.0 }
 0x15f   :  { %v1030_v10 = vpack.c.bf16 %v845_v9, %v845_v9 }
 0x161   :  { %1664 = vmatmul.mubr.bf16.vlgmr.msra.gmra.mxu1 %v1030_v10 }
 0x162   :  { %1703 = vmatprep.mubr.msk.bf16.mxu1 %vm2015_vm0, %v2014_v32  ;;  %1688 = vmatpush3.bf16.msra.mxu1 %v1827_v20 }
 0x163   :  { %1689 = vmatprep.subr.bf16.mxu1 %v2014_v32 }
 0x166   :  { %1690 = vmatpush3.bf16.msra.mxu1 %v1828_v21 }
 0x167   :  { %1691 = vmatprep.subr.bf16.mxu1 %v2014_v32 }
 0x16a   :  { %1692 = vmatpush3.bf16.msra.mxu1 %v1829_v22 }
 0x16b   :  { %1693 = vmatprep.subr.bf16.mxu1 %v2014_v32 }
 0x16e   :  { %1694 = vmatpush3.bf16.msra.mxu1 %v1830_v23 }
 0x16f   :  { %1695 = vmatprep.subr.bf16.mxu1 %v2014_v32 }
 0x172   :  { %1696 = vmatpush3.bf16.msra.mxu1 %v1831_v24 }
 0x173   :  { %1697 = vmatprep.subr.bf16.mxu1 %v2014_v32 }
 0x174   :  { %v1614_v11 = vpop.f32.mrf.mxu0 }
 0x176   :  { %v1615_v13 = vpop.f32.mrf.mxu0  ;;  %1698 = vmatpush3.bf16.msra.mxu1 %v1832_v25 }
 0x177   :  { %v1616_v14 = vadd.f32 %v1615_v13, %v1614_v11  ;;  %1699 = vmatprep.subr.bf16.mxu1 %v2014_v32 }
 0x178   :  { %v1617_v15 = vpop.f32.mrf.mxu0 }
 0x179   :  { %v1024_v16 = vadd.f32 %v1616_v14, %v1464_v12 }
 0x17a   :  { %v1618_v17 = vpop.f32.mrf.mxu0  ;;  %1700 = vmatpush3.bf16.msra.mxu1 %v1833_v26 }
 0x17b   :  { %v1029_v18 = vmax.f32 %v1024_v16, 0.0  ;;  %1701 = vmatprep.subr.bf16.mxu1 %v2014_v32 }
 0x17d   :  { %v1143_v19 = vpack.c.bf16 %v1029_v18, %v1029_v18 }
 0x17e   :  { %1702 = vmatpush3.bf16.msra.mxu1 %v1834_v27 }
 0x17f   :  { %1684 = vmatmul.mubr.bf16.vlgmr.msra.gmra.mxu0 %v1143_v19 }
 0x221   :  { %v1136_v28 = vpop.f32.mrf.mxu1 }
 0x222   :  { %v1137_v35 = vadd.f32 %v1483_v33, %v1136_v28 }
 0x223   :  { %v1665_v29 = vpop.f32.mrf.mxu1 }
 0x224   :  { %v1142_v39 = vmax.f32 %v1137_v35, 0.0 }
 0x225   :  { %v1139_v30 = vpop.f32.mrf.mxu1 }
 0x227   :  { %v1666_v31 = vpop.f32.mrf.mxu1 }
 0x23f   :  { %v1249_v36 = vpop.f32.mrf.mxu0 }
 0x240   :  { %v1250_v37 = vadd.f32 %v1492_v34, %v1249_v36 }
 0x241   :  { %v1685_v38 = vpop.f32.mrf.mxu0 }
 0x242   :  { %v1255_v32 = vmax.f32 %v1250_v37, 0.0 }
 0x243   :  { %v1252_v40 = vpop.f32.mrf.mxu0 }
 0x244   :  { %v1256_v41 = vpack.c.bf16 %v1255_v32, %v1142_v39 }
 0x245   :  { %v1686_v42 = vpop.f32.mrf.mxu0 }
 0x246   :  { %1704 = vmatmul.mubr.bf16.vlgmr.msra.gmra.mxu1 %v1256_v41 }
 0x306   :  { %v1362_v44 = vpop.f32.mrf.mxu1 }
 0x307   :  { %v1363_v45 = vadd.f32 %v1501_v43, %v1362_v44 }
 0x308   :  { %v1705_v46 = vpop.f32.mrf.mxu1 }
 0x309   :  { %1369 = vst [vmem:[#allocation14] sm:$0xff] %v1363_v45 }
 0x30a   :  { %v1365_v47 = vpop.f32.mrf.mxu1 }
 0x30b   :  { %v1366_v48 = vadd.f32 %v1501_v43, %v1365_v47 }
 0x30c   :  { %v1706_v49 = vpop.f32.mrf.mxu1 }
 0x30d   :  { %1370 = vst [vmem:[#allocation14 + $0x8] sm:$0xff] %v1366_v48 }
 0x30e   :  { %1986 = shalt.err (!%p1983_p11)
}
 0x30f   :  { %s2017_s22 = smov 128   ;;  %s2018_s11 = smov 8  }
 0x310   :  { %1382 = dma.vmem_to_hbm [thread:$0]  %s1377_s4, 256, %s2180_s12, [#allocation4], %s2017_s22, %s2017_s22, %s2018_s11  }
 0x311   :  { %2003 = dma.done.wait [#allocation4], 256  }
 0x312   :  { %2004 = vsyncadd [#allocation4], 4294967040 }
 0x313   :  { %1386 = vsyncpa [#allocation3], 1 }
 0x314   :  { %1387 = vsyncpa [#allocation6], 1 }
 0x315   :  { %1388 = vsyncpa [#allocation9], 1 }
 0x316   :  { %1389 = vsyncpa [#allocation12], 1 }
 0x317   :  { %1390 = vsyncpa [#allocation4], 1 }

</bundles_post_ra>
